<compile_context>
chip_gen: v7x
topology: tpu7x:2x2x1
jax: 0.10.0
libtpu: 0.0.40
codegen_flags: <defaults>
</compile_context>

<pallas_src>
import functools
import math

import jax
import jax.numpy as jnp
from jax.experimental import pallas as pl
from jax.experimental.pallas import tpu as pltpu


def _arc_margin_kernel(x_ref, wt_ref, wrn_ref, lab_ref, o_ref, xb_ref, xrn_ref, *,
                       s, cos_m, sin_m, th, mm, easy_margin, mxu_dtype):
    j = pl.program_id(1)                  # N-tile index (fast axis)
    tb = o_ref.shape[0]
    tile_n = o_ref.shape[-1]

    # Per-B-tile prologue: cache 1/||x|| and the MXU-dtype cast of x in VMEM
    # scratch so the j (N) sweep doesn't redo this work every step.
    @pl.when(j == 0)
    def _():
        x = x_ref[...].astype(jnp.float32)            # (TILE_B, D)
        eps = 1e-12  # matches torch F.normalize: x / max(||x||, eps)
        xrn_ref[...] = jax.lax.rsqrt(
            jnp.maximum(jnp.sum(x * x, axis=-1, keepdims=True), eps * eps))
        xb_ref[...] = x.astype(mxu_dtype)

    # MXU: [TILE_B, D] @ [D, TILE_N] with f32 accumulation; fold in the row
    # (1/||x||) and column (1/||w||) scales post-matmul (two lane/sublane
    # broadcast multiplies).
    raw = jnp.dot(xb_ref[...], wt_ref[...], preferred_element_type=jnp.float32)
    cosine = raw * xrn_ref[...] * wrn_ref[...]        # (TILE_B, TILE_N) f32

    lab = lab_ref[...]                                # (TILE_B, 1) int32
    col = jax.lax.broadcasted_iota(jnp.int32, (tb, tile_n), 1) + j * tile_n
    mask = col == lab                                 # at most one True per row

    # Slim epilogue: only the label column needs phi.  Extract cos at the label
    # column per row (masked row-reduce), do the margin math on (TILE_B, 1),
    # then one select + scale on the full tile.
    cos_lab = jnp.sum(jnp.where(mask, cosine, 0.0), axis=-1, keepdims=True)
    sin_lab = jnp.sqrt(jnp.clip(1.0 - cos_lab * cos_lab, 0.0, 1.0))
    phi = cos_lab * cos_m - sin_lab * sin_m
    if easy_margin:
        phi = jnp.where(cos_lab > 0.0, phi, cos_lab)
    else:
        phi = jnp.where(cos_lab > th, phi, cos_lab - mm)

    o_ref[...] = (jnp.where(mask, phi, cosine) * s).astype(o_ref.dtype)


def _round_up(v, m):
    return (v + m - 1) // m * m


def arc_margin_product(x, weight, label, *, s=30.0, m=0.6, easy_margin=False,
                       tile_b=256, tile_n=2048, mxu_dtype=jnp.bfloat16,
                       out_dtype=jnp.float32):
    """Pallas-backed ArcMarginProduct.forward.

    x:      (B, in_features) float
    weight: (out_features, in_features) float
    label:  (B,) int
    Returns (B, out_features) in `out_dtype` (float32 by default; pass
    jnp.bfloat16 to halve output writeback traffic).
    """
    B, D = x.shape
    N, D2 = weight.shape
    assert D == D2, (D, D2)

    # Sublane-aligned B tile, lane-dense (multiple of 128) N tile.
    TILE_B = min(_round_up(B, 8), _round_up(tile_b, 8))
    TILE_N = min(_round_up(N, 128), _round_up(tile_n, 128))
    B_pad = _round_up(B, TILE_B)
    N_pad = _round_up(N, TILE_N)

    eps = 1e-12
    # Per-class inverse norm as a tiny (1, N_pad) f32 row (N*4 bytes total).
    w_f32 = weight.astype(jnp.float32)
    w_rn = jax.lax.rsqrt(jnp.maximum(jnp.sum(w_f32 * w_f32, axis=-1), eps * eps))
    w_rn = jnp.pad(w_rn, (0, N_pad - N)).reshape(1, N_pad)

    # (D, N) MXU-dtype stream for the weight: half the HBM bytes of f32 and no
    # per-step XLU transpose inside the kernel.  Padded columns are all-zero,
    # so their cosines are exactly 0 (the eps clamp above prevents NaNs).
    w_t = jnp.pad(weight.astype(mxu_dtype).T, ((0, 0), (0, N_pad - N)))

    x_p = jnp.pad(x, ((0, B_pad - B), (0, 0)))
    lab_p = jnp.pad(label.astype(jnp.int32), (0, B_pad - B)).reshape(B_pad, 1)

    kernel = functools.partial(
        _arc_margin_kernel,
        s=float(s),
        cos_m=math.cos(m),
        sin_m=math.sin(m),
        th=math.cos(math.pi - m),
        mm=math.sin(math.pi - m) * m,
        easy_margin=easy_margin,
        mxu_dtype=mxu_dtype,
    )

    grid = (B_pad // TILE_B, N_pad // TILE_N)

    # VMEM budget: double-buffered tiles + persistent scratch, with headroom.
    w_bytes = jnp.dtype(mxu_dtype).itemsize
    x_bytes = jnp.dtype(x.dtype).itemsize
    o_bytes = jnp.dtype(out_dtype).itemsize
    est = (2 * TILE_N * D * w_bytes            # W^T tiles (streamed)
           + 2 * TILE_B * TILE_N * o_bytes     # output tiles
           + 2 * TILE_B * D * x_bytes          # x tiles (resident per B-tile)
           + 2 * TILE_N * 4 + 2 * TILE_B * 4   # w_rn row + labels
           + TILE_B * D * w_bytes + TILE_B * 4)  # scratch: cached x(bf16) + 1/||x||
    vmem_limit = max(32 << 20, min(int(est * 1.5) + (4 << 20), 100 << 20))

    out = pl.pallas_call(
        kernel,
        out_shape=jax.ShapeDtypeStruct((B_pad, N_pad), out_dtype),
        grid=grid,
        in_specs=[
            pl.BlockSpec((TILE_B, D), lambda i, j: (i, 0)),   # x: resident per B-tile
            pl.BlockSpec((D, TILE_N), lambda i, j: (0, j)),   # W^T: streamed over N
            pl.BlockSpec((1, TILE_N), lambda i, j: (0, j)),   # 1/||w|| row
            pl.BlockSpec((TILE_B, 1), lambda i, j: (i, 0)),   # labels (per-row int32)
        ],
        out_specs=pl.BlockSpec((TILE_B, TILE_N), lambda i, j: (i, j)),
        scratch_shapes=[
            pltpu.VMEM((TILE_B, D), mxu_dtype),   # cached MXU-dtype x tile
            pltpu.VMEM((TILE_B, 1), jnp.float32),  # cached 1/||x||
        ],
        compiler_params=pltpu.CompilerParams(
            # N axis is "arbitrary" so the @pl.when(j==0) scratch hoist is valid;
            # the B axis stays "parallel" for megacore sharding.
            dimension_semantics=("parallel", "arbitrary"),
            vmem_limit_bytes=vmem_limit),
        # If the W DMA stream is still exposed after enlarging TILE_N, add
        # pipeline_mode=pl.Buffered(3) to the W^T BlockSpec above.
    )(x_p, w_t, w_rn, lab_p)

    return out[:B, :N]


def _reference_f32(x, weight, label, *, s=30.0, m=0.6, easy_margin=False):
    """Faithful float32 reference (mirrors the torch module)."""
    eps = 1e-12
    xn = x / jnp.maximum(jnp.linalg.norm(x, axis=-1, keepdims=True), eps)
    wn = weight / jnp.maximum(jnp.linalg.norm(weight, axis=-1, keepdims=True), eps)
    cosine = xn @ wn.T
    sine = jnp.sqrt(jnp.clip(1.0 - cosine ** 2, 0.0, 1.0))
    phi = cosine * math.cos(m) - sine * math.sin(m)
    if easy_margin:
        phi = jnp.where(cosine > 0, phi, cosine)
    else:
        phi = jnp.where(cosine > math.cos(math.pi - m),
                        phi, cosine - math.sin(math.pi - m) * m)
    one_hot = jax.nn.one_hot(label, weight.shape[0], dtype=cosine.dtype)
    return (one_hot * phi + (1.0 - one_hot) * cosine) * s


def _reference_matched(x, weight, label, *, s=30.0, m=0.6, easy_margin=False,
                       mxu_dtype=jnp.bfloat16):
    """Pure-JAX reference using the same numerics as the kernel."""
    eps = 1e-12
    xf = x.astype(jnp.float32)
    wf = weight.astype(jnp.float32)
    x_rn = jax.lax.rsqrt(jnp.maximum(jnp.sum(xf * xf, -1, keepdims=True), eps * eps))
    w_rn = jax.lax.rsqrt(jnp.maximum(jnp.sum(wf * wf, -1, keepdims=True), eps * eps))
    raw = jnp.dot(xf.astype(mxu_dtype), weight.astype(mxu_dtype).T,
                  preferred_element_type=jnp.float32)
    cosine = raw * x_rn * w_rn.T
    sine = jnp.sqrt(jnp.clip(1.0 - cosine ** 2, 0.0, 1.0))
    phi = cosine * math.cos(m) - sine * math.sin(m)
    if easy_margin:
        phi = jnp.where(cosine > 0, phi, cosine)
    else:
        phi = jnp.where(cosine > math.cos(math.pi - m),
                        phi, cosine - math.sin(math.pi - m) * m)
    col = jnp.arange(weight.shape[0], dtype=jnp.int32)[None, :]
    return jnp.where(col == label[:, None].astype(jnp.int32), phi, cosine) * s


if __name__ == "__main__":
    key = jax.random.PRNGKey(0)
    k_x, k_w, k_l = jax.random.split(key, 3)

    B, in_features, out_features = 8, 32, 16

    x = jax.random.normal(k_x, (B, in_features), dtype=jnp.float32)
    # Deterministic xavier_uniform_-style init for weight (out_features, in_features).
    bound = math.sqrt(6.0 / (in_features + out_features))
    weight = jax.random.uniform(
        k_w, (out_features, in_features), dtype=jnp.float32,
        minval=-bound, maxval=bound)
    label = jax.random.randint(k_l, (B,), 0, out_features, dtype=jnp.int32)

    out = arc_margin_product(x, weight, label, s=30.0, m=0.6, easy_margin=False)
    out = jax.block_until_ready(out)
    assert out.shape == (B, out_features)

    # Tight check vs. a reference using the same (bf16-MXU, f32-accumulate) numerics.
    ref_m = _reference_matched(x, weight, label, s=30.0, m=0.6, easy_margin=False)
    err_m = float(jnp.max(jnp.abs(out - ref_m)))
    assert err_m < 2e-2, f"matched max abs err: {err_m}"

    # Loose sanity check vs. the full-f32 torch-style reference (bf16 MXU inputs
    # trade ~3 decimal digits of cosine precision; use mxu_dtype=jnp.float32 for
    # an exact-precision path).
    ref_f = _reference_f32(x, weight, label, s=30.0, m=0.6, easy_margin=False)
    err_f = float(jnp.max(jnp.abs(out - ref_f)))
    assert err_f < 0.5, f"f32-reference max abs err too large: {err_f}"

    print("KERNEL_OK")
</pallas_src>

<mosaic_0001>
module attributes {stable_mosaic.version = 11 : i64} {
  func.func @_arc_margin_kernel(%arg0: i32, %arg1: i32, %arg2: memref<8x32xf32, #tpu.memory_space<vmem>>, %arg3: memref<32x128xbf16, #tpu.memory_space<vmem>>, %arg4: memref<1x128xf32, #tpu.memory_space<vmem>>, %arg5: memref<8x1xi32, #tpu.memory_space<vmem>>, %arg6: memref<8x128xf32, #tpu.memory_space<vmem>>, %arg7: memref<8x32xbf16, #tpu.memory_space<vmem>>, %arg8: memref<8x1xf32, #tpu.memory_space<vmem>>) attributes {dimension_semantics = [#tpu.dimension_semantics<parallel>, #tpu.dimension_semantics<arbitrary>], iteration_bounds = array<i64: 1, 1>, scalar_prefetch = 0 : i64, scratch_operands = 2 : i64, tpu.core_type = #tpu.core_type<tc>, window_params = [{transform_indices = @transform_0, window_bounds = array<i64: 8, 32>}, {transform_indices = @transform_1, window_bounds = array<i64: 32, 128>}, {transform_indices = @transform_2, window_bounds = array<i64: 1, 128>}, {transform_indices = @transform_3, window_bounds = array<i64: 8, 1>}, {transform_indices = @transform_4, window_bounds = array<i64: 8, 128>}]} {
    %c0_i32 = arith.constant 0 : i32
    %0 = arith.cmpi eq, %arg1, %c0_i32 : i32
    %1 = arith.extui %0 : i1 to i32
    %c0_i32_0 = arith.constant 0 : i32
    %2 = arith.cmpi ne, %1, %c0_i32_0 : i32
    scf.if %2 {
      %c0_22 = arith.constant 0 : index
      %c0_23 = arith.constant 0 : index
      %47 = vector.load %arg2[%c0_22, %c0_23] : memref<8x32xf32, #tpu.memory_space<vmem>>, vector<8x32xf32>
      %48 = arith.mulf %47, %47 : vector<8x32xf32>
      %cst_24 = arith.constant dense<0.000000e+00> : vector<8xf32>
      %49 = vector.multi_reduction <add>, %48, %cst_24 [1] : vector<8x32xf32> to vector<8xf32>
      %50 = vector.shape_cast %49 : vector<8xf32> to vector<8x1xf32>
      %cst_25 = arith.constant 1.000000e-24 : f32
      %51 = vector.broadcast %cst_25 : f32 to vector<8x1xf32>
      %52 = arith.maximumf %50, %51 : vector<8x1xf32>
      %53 = math.rsqrt %52 : vector<8x1xf32>
      %c0_26 = arith.constant 0 : index
      %c0_27 = arith.constant 0 : index
      %54 = vector.load %arg8[%c0_26, %c0_27] : memref<8x1xf32, #tpu.memory_space<vmem>>, vector<8x1xf32>
      tpu.vector_store %arg8[%c0_26, %c0_27], %53 {strides = array<i32>} : memref<8x1xf32, #tpu.memory_space<vmem>>, vector<8x1xf32>,
      %55 = arith.truncf %47 : vector<8x32xf32> to vector<8x32xbf16>
      %c0_28 = arith.constant 0 : index
      %c0_29 = arith.constant 0 : index
      %56 = vector.load %arg7[%c0_28, %c0_29] : memref<8x32xbf16, #tpu.memory_space<vmem>>, vector<8x32xbf16>
      tpu.vector_store %arg7[%c0_28, %c0_29], %55 {strides = array<i32>} : memref<8x32xbf16, #tpu.memory_space<vmem>>, vector<8x32xbf16>,
    } else {
    }
    %c0 = arith.constant 0 : index
    %c0_1 = arith.constant 0 : index
    %3 = vector.load %arg7[%c0, %c0_1] : memref<8x32xbf16, #tpu.memory_space<vmem>>, vector<8x32xbf16>
    %c0_2 = arith.constant 0 : index
    %c0_3 = arith.constant 0 : index
    %4 = vector.load %arg3[%c0_2, %c0_3] : memref<32x128xbf16, #tpu.memory_space<vmem>>, vector<32x128xbf16>
    %cst = arith.constant dense<0.000000e+00> : vector<8x128xf32>
    %5 = tpu.matmul %3, %4, %cst {dimension_numbers = #tpu.dot_dimension_numbers<[1], [0], [0], [1], [0, 0, 1, 1], [], []>} : vector<8x32xbf16>, vector<32x128xbf16>, vector<8x128xf32> -> vector<8x128xf32>
    %c0_4 = arith.constant 0 : index
    %c0_5 = arith.constant 0 : index
    %6 = vector.load %arg8[%c0_4, %c0_5] : memref<8x1xf32, #tpu.memory_space<vmem>>, vector<8x1xf32>
    %7 = vector.broadcast %6 : vector<8x1xf32> to vector<8x128xf32>
    %8 = arith.mulf %5, %7 : vector<8x128xf32>
    %c0_6 = arith.constant 0 : index
    %c0_7 = arith.constant 0 : index
    %9 = vector.load %arg4[%c0_6, %c0_7] : memref<1x128xf32, #tpu.memory_space<vmem>>, vector<1x128xf32>
    %10 = vector.broadcast %9 : vector<1x128xf32> to vector<8x128xf32>
    %11 = arith.mulf %8, %10 : vector<8x128xf32>
    %c0_8 = arith.constant 0 : index
    %c0_9 = arith.constant 0 : index
    %12 = vector.load %arg5[%c0_8, %c0_9] : memref<8x1xi32, #tpu.memory_space<vmem>>, vector<8x1xi32>
    %13 = tpu.iota {dimensions = array<i32: 1>} : vector<8x128xi32>
    %c128_i32 = arith.constant 128 : i32
    %14 = arith.muli %arg1, %c128_i32 : i32
    %15 = vector.broadcast %14 : i32 to vector<8x128xi32>
    %16 = arith.addi %13, %15 : vector<8x128xi32>
    %17 = vector.broadcast %12 : vector<8x1xi32> to vector<8x128xi32>
    %18 = arith.cmpi eq, %16, %17 : vector<8x128xi32>
    %cst_10 = arith.constant 0.000000e+00 : f32
    %19 = vector.broadcast %cst_10 : f32 to vector<8x128xf32>
    %20 = arith.select %18, %11, %19 : vector<8x128xi1>, vector<8x128xf32>
    %cst_11 = arith.constant dense<0.000000e+00> : vector<8xf32>
    %21 = vector.multi_reduction <add>, %20, %cst_11 [1] : vector<8x128xf32> to vector<8xf32>
    %22 = vector.shape_cast %21 : vector<8xf32> to vector<8x1xf32>
    %23 = arith.mulf %22, %22 : vector<8x1xf32>
    %cst_12 = arith.constant 1.000000e+00 : f32
    %24 = vector.broadcast %cst_12 : f32 to vector<8x1xf32>
    %25 = arith.subf %24, %23 : vector<8x1xf32>
    %cst_13 = arith.constant 0.000000e+00 : f32
    %cst_14 = arith.constant 1.000000e+00 : f32
    %26 = vector.broadcast %cst_13 : f32 to vector<8x1xf32>
    %27 = arith.maximumf %26, %25 : vector<8x1xf32>
    %28 = vector.broadcast %cst_14 : f32 to vector<8x1xf32>
    %29 = arith.minimumf %28, %27 : vector<8x1xf32>
    %30 = math.sqrt %29 : vector<8x1xf32>
    %cst_15 = arith.constant 0.825335621 : f32
    %31 = vector.broadcast %cst_15 : f32 to vector<8x1xf32>
    %32 = arith.mulf %22, %31 : vector<8x1xf32>
    %cst_16 = arith.constant 0.564642489 : f32
    %33 = vector.broadcast %cst_16 : f32 to vector<8x1xf32>
    %34 = arith.mulf %30, %33 : vector<8x1xf32>
    %35 = arith.subf %32, %34 : vector<8x1xf32>
    %cst_17 = arith.constant -0.825335621 : f32
    %36 = vector.broadcast %cst_17 : f32 to vector<8x1xf32>
    %37 = arith.cmpf ogt, %22, %36 : vector<8x1xf32>
    %cst_18 = arith.constant 0.33878547 : f32
    %38 = vector.broadcast %cst_18 : f32 to vector<8x1xf32>
    %39 = arith.subf %22, %38 : vector<8x1xf32>
    %40 = arith.select %37, %35, %39 : vector<8x1xi1>, vector<8x1xf32>
    %41 = vector.shape_cast %40 : vector<8x1xf32> to vector<8x1xf32>
    %42 = vector.broadcast %41 : vector<8x1xf32> to vector<8x128xf32>
    %43 = arith.select %18, %42, %11 : vector<8x128xi1>, vector<8x128xf32>
    %cst_19 = arith.constant 3.000000e+01 : f32
    %44 = vector.broadcast %cst_19 : f32 to vector<8x128xf32>
    %45 = arith.mulf %43, %44 : vector<8x128xf32>
    %c0_20 = arith.constant 0 : index
    %c0_21 = arith.constant 0 : index
    %46 = vector.load %arg6[%c0_20, %c0_21] : memref<8x128xf32, #tpu.memory_space<vmem>>, vector<8x128xf32>
    tpu.vector_store %arg6[%c0_20, %c0_21], %45 {strides = array<i32>} : memref<8x128xf32, #tpu.memory_space<vmem>>, vector<8x128xf32>,
    return
  }
  func.func @transform_0(%arg0: i32, %arg1: i32) -> (i32, i32) {
    %c0_i32 = arith.constant 0 : i32
    %c0_i32_0 = arith.constant 0 : i32
    return %arg0, %c0_i32 : i32, i32
  }
  func.func @transform_1(%arg0: i32, %arg1: i32) -> (i32, i32) {
    %c0_i32 = arith.constant 0 : i32
    %c0_i32_0 = arith.constant 0 : i32
    return %c0_i32, %arg1 : i32, i32
  }
  func.func @transform_2(%arg0: i32, %arg1: i32) -> (i32, i32) {
    %c0_i32 = arith.constant 0 : i32
    %c0_i32_0 = arith.constant 0 : i32
    return %c0_i32, %arg1 : i32, i32
  }
  func.func @transform_3(%arg0: i32, %arg1: i32) -> (i32, i32) {
    %c0_i32 = arith.constant 0 : i32
    %c0_i32_0 = arith.constant 0 : i32
    return %arg0, %c0_i32 : i32, i32
  }
  func.func @transform_4(%arg0: i32, %arg1: i32) -> (i32, i32) {
    %c0_i32 = arith.constant 0 : i32
    return %arg0, %arg1 : i32, i32
  }
}

</mosaic_0001>

<bundles_post_ra>
// kernel: tpu_custom_call.1
= control target key start
LH: loop header
LB: loop body
LE: loop exit
PB: predicated region body
PF: predicated region fallthrough
CT: control target
= control target key end

     0   :  { %9 = vsyncpa [#allocation5], 0  ;;  %s320_s0 = inlined_call_operand.vmem [shape: f32[8,32], index: 0, kind: input, shape index: {}]   ;;  %s321_s1 = inlined_call_operand.hbm [shape: bf16[32,128], index: 1, kind: input, shape index: {}]   ;;  %s322_s2 = inlined_call_operand.vmem [shape: f32[1,128], index: 2, kind: input, shape index: {}]   ;;  %s323_s3 = inlined_call_operand.vmem [shape: s32[8,1], index: 3, kind: input, shape index: {}]   ;;  %s324_s4 = inlined_call_operand.hbm [shape: f32[8,128], index: 4, kind: output, shape index: {}]  }
   0x1   :  { %10 = vsyncpa [#allocation6], 0  ;;  %s253_s15 = smov [#allocation4]   ;;  %s205_s19 = scalar_lea.hbm %s321_s1, 256 }
   0x2   :  { %s18_s16 = sshll.u32 %s253_s15, 4  ;;  %p206_p0 = scmp.ne.s32.totalorder %s321_s1, %s205_s19  ;;  %s19_s16 = int_to_ptr.vmem [resolvable:$true] %s18_s16 }
   0x3   :  { %p209_p1 = scmp.lt.u32.totalorder %s205_s19, %s321_s1 }
   0x5   :  { %p211_p2 = pnand %p209_p1, %p206_p0 }
   0x7   :  { %214 = shalt.err (!%p211_p2)
}
   0x8   :  { %s215_s24 = scalar_lea.vmem %s19_s16, 256  ;;  %p220_p4 = scmp.lt.s32.totalorder %s19_s16, %s19_s16 }
   0x9   :  { %p216_p3 = scmp.ne.s32.totalorder %s19_s16, %s215_s24  ;;  %p221_p5 = scmp.lt.s32.totalorder %s215_s24, %s215_s24 }
   0xb   :  { %p222_p6 = por %p221_p5, %p220_p4 }
   0xd   :  { %p223_p7 = pnand %p222_p6, %p216_p3 }
   0xf   :  { %226 = shalt.err (!%p223_p7)
}
  0x10   :  { %s254_s25 = smov 64   ;;  %s255_s26 = smov 4  }
  0x11   :  { %24 = dma.hbm_to_vmem [thread:$0]  %s321_s1, 256, %s19_s16, [#allocation5], %s254_s25, %s254_s25, %s255_s26  }
  0x12   :  { %249 = dma.done.wait [#allocation5], 256  }
  0x13   :  { %250 = vsyncadd [#allocation5], 4294967040  ;;  %v256_v0 = vmov 0.0   ;;  %vm257_vm0 = vmmov 0   ;;  %vm39_vm1 = vcmask 261120   ;;  %v37_v1 = vld [vmem:[%s320_s0] sm:$0xff]  ;;  %v127_v18 = vlaneseq }
  0x14   :  { %182 = vmatprep.subr.bf16.mxu0 %v256_v0  ;;  %186 = vmatprep.mubr.msk.bf16.mxu0 %vm257_vm0, %v256_v0  ;;  %vm48_vm2 = vcmask 257024   ;;  %v38_v2 = vmul.f32 %v37_v1, %v37_v1  ;;  %v47_v3 = vpack.c.bf16 %v37_v1, %v37_v1  ;;  %v199_v4 = vld [vmem:[#allocation4] sm:$0xff]   ;;  %v200_v6 = vld [vmem:[#allocation4 + $0x8] sm:$0xff]   ;;  %v258_v8 = vmov 0   ;;  %v126_v9 = vld [vmem:[%s323_s3] sm:$0xff] }
  0x15   :  { %183 = vmatpush3.bf16.msra.mxu0 %v199_v4  ;;  %197 = vset.pattern.permute.xlu0 %v258_v8  ;;  %vm45_vm3 = vcmask 7168   ;;  %v128_v19 = vand.u32 127, %v127_v18  ;;  %v177_v22 = vld [vmem:[%s322_s2] ss:$0 sm:$0xff]  ;;  %s259_s2 = smov [#allocation7]  }
  0x16   :  { %v40_v5 = vsel %vm39_vm1, %v38_v2, 0.0  ;;  %49 = vst.msk [vmem:[#allocation2] sm:$0xf] %vm48_vm2, %v47_v3  ;;  %184 = vmatprep.subr.bf16.mxu0 %v256_v0  ;;  %198 = vset.pattern.permute.xlu1 %v258_v8  ;;  %s165_s3 = sshll.u32 %s259_s2, 4  ;;  %s166_s3 = int_to_ptr.vmem [resolvable:$true] %s165_s3 }
  0x17   :  { %41 = vadd.xlane.f32.xlu0 %v40_v5  ;;  %133 = vperm.xlu1 %198, %v126_v9   ;;  %s227_s7 = scalar_lea.vmem %s166_s3, 128  ;;  %p232_p9 = scmp.lt.s32.totalorder %s166_s3, %s166_s3 }
  0x18   :  { %p228_p8 = scmp.ne.s32.totalorder %s166_s3, %s227_s7  ;;  %p233_p10 = scmp.lt.s32.totalorder %s227_s7, %s227_s7 }
  0x19   :  { %185 = vmatpush3.bf16.msra.mxu0 %v200_v6 }
  0x1a   :  { %p234_p11 = por %p233_p10, %p232_p9 }
  0x1c   :  { %p235_p12 = pnand %p234_p11, %p228_p8 }
  0x1d   :  { %v50_v7 = vld [vmem:[#allocation2] sm:$0xf] }
  0x1e   :  { %187 = vmatmul.mubr.msk.bf16.vlgmr.msra.gmra.mrb[0].mxu0 %vm39_vm1, %v50_v7 }
  0x96   :  { %v134_v20 = vpop.permute.xlu1 %133 }
  0x97   :  { %vm135_vm4 = vcmp.eq.s32.totalorder %v128_v19, %v134_v20 }
  0xa4   :  { %v42_v10 = vpop.xlane.xlu0 %41 }
  0xa5   :  { %v43_v11 = vmax.f32 %v42_v10, 1e-24 }
  0xa7   :  { %201 = vrsqrt.f32 %v43_v11 }
  0xb1   :  { %v202_v12 = vpop.eup %201 }
  0xb2   :  { %46 = vst.msk [vmem:[#allocation3] sm:$0xff] %vm45_vm3, %v202_v12 }
  0xb9   :  { %v111_v13 = vld [vmem:[#allocation3] sm:$0xff] }
  0xba   :  { %114 = vperm.xlu0 %197, %v111_v13  }
  0xf1   :  { %v105_v14 = vpop.f32.mrb[0].mxu0 }
  0xf2   :  { %v188_v15 = vpop.f32.mrb[1].mxu0 }
  0xf3   :  { %v108_v16 = vpop.f32.mrb[2].mxu0 }
  0xf4   :  { %v189_v17 = vpop.f32.mrb[3].mxu0 }
 0x139   :  { %v115_v21 = vpop.permute.xlu0 %114 }
 0x13a   :  { %v117_v23 = vmul.f32 %v115_v21, %v105_v14 }
 0x13c   :  { %v125_v24 = vmul.f32 %v177_v22, %v117_v23 }
 0x13e   :  { %v136_v25 = vsel %vm135_vm4, %v125_v24, 0.0 }
 0x13f   :  { %137 = vadd.xlane.f32.xlu1 %v136_v25 }
 0x1cc   :  { %v138_v26 = vpop.xlane.xlu1 %137 }
 0x1cd   :  { %v139_v27 = vmul.f32 %v138_v26, %v138_v26  ;;  %v150_v36 = vmul.f32 0.8253356, %v138_v26  ;;  %v178_v39 = vadd.f32 -0.33878547, %v138_v26  ;;  %vm153_vm7 = vcmp.gt.f32.partialorder %v138_v26, -0.8253356 }
 0x1cf   :  { %v140_v28 = vsub.f32 1.0, %v139_v27 }
 0x1d1   :  { %v141_v29 = vmax.f32 %v140_v28, 0.0 }
 0x1d3   :  { %v142_v30 = vmin.f32 %v141_v29, 1.0 }
 0x1d5   :  { %203 = vrsqrt.f32 %v142_v30  ;;  %vm145_vm5 = vcmp.eq.f32.partialorder %v142_v30, inf  ;;  %v148_v33 = vand.u32 2147483648, %v142_v30  ;;  %vm147_vm6 = vcmp.eq.f32.partialorder %v142_v30, 0.0 }
 0x1df   :  { %v204_v31 = vpop.eup %203 }
 0x1e0   :  { %v144_v32 = vmul.f32 %v204_v31, %v142_v30 }
 0x1e2   :  { %v146_v34 = vsel %vm145_vm5, %v142_v30, %v144_v32 }
 0x1e3   :  { %v149_v35 = vsel %vm147_vm6, %v148_v33, %v146_v34 }
 0x1e4   :  { %v151_v37 = vmul.f32 0.5646425, %v149_v35 }
 0x1e6   :  { %v152_v38 = vsub.f32 %v150_v36, %v151_v37 }
 0x1e8   :  { %v155_v40 = vsel %vm153_vm7, %v152_v38, %v178_v39 }
 0x1e9   :  { %v156_v41 = vsel %vm135_vm4, %v155_v40, %v125_v24 }
 0x1ea   :  { %v157_v42 = vmul.f32 30.0, %v156_v41 }
 0x1ec   :  { %158 = vst [vmem:[#allocation7] sm:$0xff] %v157_v42 }
 0x1ed   :  { %238 = shalt.err (!%p235_p12)
}
 0x1ee   :  { %s239_s10 = scalar_lea.hbm %s324_s4, 128 }
 0x1ef   :  { %p240_p13 = scmp.ne.s32.totalorder %s324_s4, %s239_s10  ;;  %p243_p0 = scmp.lt.u32.totalorder %s239_s10, %s324_s4 }
 0x1f1   :  { %p245_p1 = pnand %p243_p0, %p240_p13 }
 0x1f3   :  { %248 = shalt.err (!%p245_p1)
}
 0x1f4   :  { %168 = dma.vmem_to_hbm [thread:$0]  %s166_s3, 128, %s324_s4, [#allocation6]  }
 0x1f5   :  { %251 = dma.done.wait [#allocation6], 128  }
 0x1f6   :  { %252 = vsyncadd [#allocation6], 4294967168 }
 0x1f7   :  { %172 = vsyncpa [#allocation5], 1 }
 0x1f8   :  { %173 = vsyncpa [#allocation6], 1 }

</bundles_post_ra>
